<compile_context>
chip_gen: v6e
topology: v6e:2x2x1
jax: 0.10.0
libtpu: 0.0.40
codegen_flags: <defaults>
</compile_context>

<pallas_src>
import functools
import math

import jax
import jax.numpy as jnp
from jax import lax
from jax.experimental import pallas as pl
from jax.experimental.pallas import tpu as pltpu


# ----------------------------- fused MHA kernel ----------------------------- #

def _mha_fused_kernel(q_ref, k_ref, v_ref, w_ref, b_ref, o_ref, *,
                      num_heads, lq, lkv, batch_block):
    """One grid step = `batch_block` batches of full multi-head attention.

    q_ref: (BG*Lq,  Dq)            k_ref/v_ref: (BG*Lkv, Dk/Dv)
    w_ref: (Dq+Dk+Dv+D, D) packed  [Wq*scale | Wk | Wv | Wo]   (row-stacked)
    b_ref: (4, 1, D)       packed  [bq*scale, bk, bv, bo]
    o_ref: (BG*Lq, D)
    """
    dq = q_ref.shape[-1]
    dk = k_ref.shape[-1]
    dv = v_ref.shape[-1]
    D = w_ref.shape[-1]
    d = D // num_heads

    # Static sub-views of the packed parameter slabs: no extra DMA, just
    # sublane-offset loads from the already-resident VMEM block.
    wq = w_ref[0:dq, :]                              # 1/sqrt(d) folded in
    wk = w_ref[dq:dq + dk, :]
    wv = w_ref[dq + dk:dq + dk + dv, :]
    wo = w_ref[dq + dk + dv:dq + dk + dv + D, :]
    bq = b_ref[0]                                    # (1, D), scale folded in
    bk = b_ref[1]
    bv = b_ref[2]
    bo = b_ref[3]

    # Q/K/V projections for the whole batch group at once: (BG*L, Din)@(Din, D)
    # -> one MXU sequence per projection, better sublane fill than per-batch.
    # NOTE: operands kept f32 (tiny shapes; exact match vs the f32 reference).
    # TODO(synk): when queries/keys/values alias (self-attention) these three
    # dots could be one (L, Din) @ (Din, 3D) matmul with [Wq|Wk|Wv] packed
    # column-wise; the general cross-attention layout is kept here.
    xq = q_ref[...].astype(jnp.float32)
    xk = k_ref[...].astype(jnp.float32)
    xv = v_ref[...].astype(jnp.float32)

    q2d = jnp.dot(xq, wq, preferred_element_type=jnp.float32) + bq
    k2d = jnp.dot(xk, wk, preferred_element_type=jnp.float32) + bk
    v2d = jnp.dot(xv, wv, preferred_element_type=jnp.float32) + bv

    for b in range(batch_block):                     # static unroll (tiny)
        qb = q2d[b * lq:(b + 1) * lq, :]             # (Lq, D)
        kb = k2d[b * lkv:(b + 1) * lkv, :]           # (Lkv, D)
        vb = v2d[b * lkv:(b + 1) * lkv, :]

        outs = []
        for h in range(num_heads):                   # static unroll over heads
            sl = slice(h * d, (h + 1) * d)
            qh, kh, vh = qb[:, sl], kb[:, sl], vb[:, sl]

            # scores = qh @ kh^T via contraction on the last axis of both
            # operands (no explicit transpose). 1/sqrt(d) already in Wq/bq.
            scores = lax.dot_general(
                qh, kh, (((1,), (1,)), ((), ())),
                preferred_element_type=jnp.float32)  # (Lq, Lkv)

            # softmax over keys; exact divide (approx reciprocal removed per
            # review — not on the critical path, tighter numerics for free).
            m = jnp.max(scores, axis=-1, keepdims=True)
            p = jnp.exp(scores - m)
            attn = p / jnp.sum(p, axis=-1, keepdims=True)
            # TODO(synk): valid_lens masking (masked_softmax) and attention
            # dropout are not implemented — eval / unmasked path only.

            outs.append(jnp.dot(attn, vh,
                                preferred_element_type=jnp.float32))  # (Lq, d)

        # Concat heads into ONE lane-dense (Lq, D) buffer, then a single
        # (Lq, D) @ (D, D) W_o matmul (replaces H tiny matmuls + adds).
        out_cat = jnp.concatenate(outs, axis=-1)
        res = jnp.dot(out_cat, wo, preferred_element_type=jnp.float32) + bo
        o_ref[b * lq:(b + 1) * lq, :] = res.astype(o_ref.dtype)


def pallas_mha_fused(queries, keys, values, w_all, b_all, num_heads, *,
                     batch_block=None):
    """Fused multi-head attention.

    queries: (B, Lq, Dq); keys/values: (B, Lkv, Dk/Dv).  Returns (B, Lq, D).
    w_all: (Dq+Dk+Dv+D, D) packed [Wq*scale | Wk | Wv | Wo].
    b_all: (4, 1, D) packed [bq*scale, bk, bv, bo].
    batch_block: batches per grid step. Default keeps >=2 parallel steps
      (feeds both v7x TensorCores); pass batch_block=B on single-TC v5e/v6e
      to collapse to one grid step and halve per-step overhead.
    """
    B, Lq, Dq = queries.shape
    _, Lkv, Dk = keys.shape
    Dv = values.shape[-1]
    D = w_all.shape[-1]
    assert w_all.shape[0] == Dq + Dk + Dv + D
    assert keys.shape[0] == B and values.shape[:2] == keys.shape[:2]

    if batch_block is None:
        batch_block = 1 if B >= 2 else B
    assert B % batch_block == 0
    grid = (B // batch_block,)

    # Flatten (B, L, Din) -> (B*L, Din) on the XLA side: a free, contiguity-
    # preserving reshape (metadata only, no compute hoisted into the wrapper)
    # so the kernel sees dense 2-D blocks and needs zero in-kernel relayout.
    q2 = queries.reshape(B * Lq, Dq)
    k2 = keys.reshape(B * Lkv, Dk)
    v2 = values.reshape(B * Lkv, Dv)

    kernel = functools.partial(_mha_fused_kernel, num_heads=num_heads,
                               lq=Lq, lkv=Lkv, batch_block=batch_block)

    def rows_spec(rows_per_step, feat):
        return pl.BlockSpec((rows_per_step, feat), lambda g: (g, 0))

    def full_spec(shape):
        return pl.BlockSpec(shape, lambda g: (0,) * len(shape))

    out2 = pl.pallas_call(
        kernel,
        out_shape=jax.ShapeDtypeStruct((B * Lq, D), queries.dtype),
        grid=grid,
        in_specs=[rows_spec(batch_block * Lq, Dq),
                  rows_spec(batch_block * Lkv, Dk),
                  rows_spec(batch_block * Lkv, Dv),
                  full_spec(w_all.shape),
                  full_spec(b_all.shape)],
        out_specs=rows_spec(batch_block * Lq, D),
        compiler_params=pltpu.CompilerParams(
            dimension_semantics=("parallel",)),      # shards steps across TCs
    )(q2, k2, v2, w_all, b_all)
    return out2.reshape(B, Lq, D)


# --------------------------------- modules --------------------------------- #

class MultiHeadAttentionPallas:
    def __init__(self, key_size, query_size, value_size, num_hiddens,
                 num_heads, dropout=0.0, bias=True, *, seed=0):
        self.num_heads = num_heads
        self.num_hiddens = num_hiddens
        key = jax.random.PRNGKey(seed)
        ks = jax.random.split(key, 8)

        def init_linear(kw, kb, in_f, out_f):
            # deterministic, PyTorch-Linear-style uniform init
            bound = 1.0 / math.sqrt(in_f)
            w = jax.random.uniform(kw, (in_f, out_f), jnp.float32, -bound, bound)
            b = jax.random.uniform(kb, (out_f,), jnp.float32, -bound, bound)
            return w, b

        self.Wq, self.bq = init_linear(ks[0], ks[1], query_size, num_hiddens)
        self.Wk, self.bk = init_linear(ks[2], ks[3], key_size, num_hiddens)
        self.Wv, self.bv = init_linear(ks[4], ks[5], value_size, num_hiddens)
        self.Wo, self.bo = init_linear(ks[6], ks[7], num_hiddens, num_hiddens)

        # --- one-time parameter prep (perf-review items) --------------------
        # Fold 1/sqrt(d) into Wq/bq and pack everything into two slabs so the
        # pallas_call has 5 operands instead of 11.
        d = num_hiddens // num_heads
        scale = 1.0 / math.sqrt(d)
        self.w_all = jnp.concatenate(
            [self.Wq * scale, self.Wk, self.Wv, self.Wo], axis=0)
        self.b_all = jnp.stack(
            [self.bq * scale, self.bk, self.bv, self.bo],
            axis=0).reshape(4, 1, num_hiddens)

    def __call__(self, queries, keys, values, valid_lens=None, *,
                 batch_block=None):
        # TODO(synk): valid_lens masking (masked_softmax) not implemented; the
        # exercised path uses valid_lens=None (eval, unmasked).
        return pallas_mha_fused(queries, keys, values, self.w_all, self.b_all,
                                self.num_heads, batch_block=batch_block)


class EncoderDecoderPallas:
    """Mirrors EncoderDecoder.forward: encode -> init_state -> decode.

    The encoder block is self-attention over enc_X; the decoder block is
    cross-attention of dec_X against the encoder outputs (its init_state).
    TODO(synk): the surrounding embedding / add&norm / FFN layers of the full
    cptr blocks are not kernelized here; fusing them into the same pallas_call
    as the attention is the next-level optimization suggested by the review.
    """

    def __init__(self, encoder, decoder):
        self.encoder = encoder
        self.decoder = decoder

    def __call__(self, enc_X, dec_X, *args):
        enc_outputs = self.encoder(enc_X, enc_X, enc_X, *args)
        dec_state = enc_outputs                       # decoder.init_state
        return self.decoder(dec_X, dec_state, dec_state, *args)


# ------------------------------ reference (jnp) ----------------------------- #

def _transpose_qkv(x, num_heads):
    B, L, D = x.shape
    x = x.reshape(B, L, num_heads, D // num_heads)
    x = jnp.transpose(x, (0, 2, 1, 3))
    return x.reshape(B * num_heads, L, D // num_heads)


def _transpose_output(x, num_heads):
    BH, L, d = x.shape
    x = x.reshape(BH // num_heads, num_heads, L, d)
    x = jnp.transpose(x, (0, 2, 1, 3))
    return x.reshape(x.shape[0], L, num_heads * d)


def reference_mha(mha, queries, keys, values):
    def lin(x, w, b):
        return x @ w + b
    q = _transpose_qkv(lin(queries, mha.Wq, mha.bq), mha.num_heads)
    k = _transpose_qkv(lin(keys, mha.Wk, mha.bk), mha.num_heads)
    v = _transpose_qkv(lin(values, mha.Wv, mha.bv), mha.num_heads)
    d = q.shape[-1]
    scores = jnp.einsum("bqd,bkd->bqk", q, k) / math.sqrt(d)
    attn = jax.nn.softmax(scores, axis=-1)
    out = jnp.einsum("bqk,bkd->bqd", attn, v)
    out_concat = _transpose_output(out, mha.num_heads)
    return lin(out_concat, mha.Wo, mha.bo)


if __name__ == "__main__":
    B, L = 2, 8
    query_size = key_size = value_size = 32
    num_hiddens, num_heads = 32, 4

    root = jax.random.PRNGKey(0)
    kq, kk, kv, kd = jax.random.split(root, 4)
    queries = jax.random.normal(kq, (B, L, query_size), jnp.float32)
    keys = jax.random.normal(kk, (B, L, key_size), jnp.float32)
    values = jax.random.normal(kv, (B, L, value_size), jnp.float32)

    mha = MultiHeadAttentionPallas(key_size, query_size, value_size,
                                   num_hiddens, num_heads, dropout=0.0, seed=0)
    ref = reference_mha(mha, queries, keys, values)

    # (1) default grid: two "parallel" steps of one batch each (v7x-friendly).
    out = jax.block_until_ready(mha(queries, keys, values, valid_lens=None))
    assert out.shape == (B, L, num_hiddens), out.shape
    assert jnp.allclose(out, ref, atol=3e-3, rtol=3e-3), "mismatch (default grid)"

    # (2) collapsed grid: single step over the whole batch (v5e/v6e config).
    out1 = jax.block_until_ready(
        mha(queries, keys, values, valid_lens=None, batch_block=B))
    assert jnp.allclose(out1, ref, atol=3e-3, rtol=3e-3), "mismatch (collapsed grid)"

    # (3) EncoderDecoder-style composition: encode -> init_state -> decode.
    enc_mha = MultiHeadAttentionPallas(key_size, query_size, value_size,
                                       num_hiddens, num_heads, seed=1)
    dec_mha = MultiHeadAttentionPallas(num_hiddens, num_hiddens, num_hiddens,
                                       num_hiddens, num_heads, seed=2)
    model = EncoderDecoderPallas(enc_mha, dec_mha)
    enc_X = queries
    dec_X = jax.random.normal(kd, (B, L, num_hiddens), jnp.float32)
    out_ed = jax.block_until_ready(model(enc_X, dec_X))
    ref_enc = reference_mha(enc_mha, enc_X, enc_X, enc_X)
    ref_ed = reference_mha(dec_mha, dec_X, ref_enc, ref_enc)
    assert out_ed.shape == (B, L, num_hiddens), out_ed.shape
    # chained check (two attention layers): slightly looser tolerance since
    # TPU-default matmul rounding differences compound across the two layers.
    assert jnp.allclose(out_ed, ref_ed, atol=1e-2, rtol=1e-2), "mismatch (enc-dec)"

    print("KERNEL_OK")
</pallas_src>

<mosaic_0001>
module attributes {stable_mosaic.version = 11 : i64} {
  func.func @_mha_fused_kernel(%arg0: i32, %arg1: memref<8x32xf32, #tpu.memory_space<vmem>>, %arg2: memref<8x32xf32, #tpu.memory_space<vmem>>, %arg3: memref<8x32xf32, #tpu.memory_space<vmem>>, %arg4: memref<128x32xf32, #tpu.memory_space<vmem>>, %arg5: memref<4x1x32xf32, #tpu.memory_space<vmem>>, %arg6: memref<8x32xf32, #tpu.memory_space<vmem>>) attributes {dimension_semantics = [#tpu.dimension_semantics<parallel>], iteration_bounds = array<i64: 2>, scalar_prefetch = 0 : i64, scratch_operands = 0 : i64, tpu.core_type = #tpu.core_type<tc>, window_params = [{transform_indices = @transform_0, window_bounds = array<i64: 8, 32>}, {transform_indices = @transform_1, window_bounds = array<i64: 8, 32>}, {transform_indices = @transform_2, window_bounds = array<i64: 8, 32>}, {pipeline_mode = #tpu.pipeline_mode<synchronous>, transform_indices = @transform_3, window_bounds = array<i64: 128, 32>}, {pipeline_mode = #tpu.pipeline_mode<synchronous>, transform_indices = @transform_4, window_bounds = array<i64: 4, 1, 32>}, {transform_indices = @transform_5, window_bounds = array<i64: 8, 32>}]} {
    %c0 = arith.constant 0 : index
    %c0_0 = arith.constant 0 : index
    %0 = vector.load %arg4[%c0, %c0_0] : memref<128x32xf32, #tpu.memory_space<vmem>>, vector<32x32xf32>
    %c32 = arith.constant 32 : index
    %c0_1 = arith.constant 0 : index
    %1 = vector.load %arg4[%c32, %c0_1] : memref<128x32xf32, #tpu.memory_space<vmem>>, vector<32x32xf32>
    %c64 = arith.constant 64 : index
    %c0_2 = arith.constant 0 : index
    %2 = vector.load %arg4[%c64, %c0_2] : memref<128x32xf32, #tpu.memory_space<vmem>>, vector<32x32xf32>
    %c96 = arith.constant 96 : index
    %c0_3 = arith.constant 0 : index
    %3 = vector.load %arg4[%c96, %c0_3] : memref<128x32xf32, #tpu.memory_space<vmem>>, vector<32x32xf32>
    %c0_4 = arith.constant 0 : index
    %c0_5 = arith.constant 0 : index
    %c0_6 = arith.constant 0 : index
    %4 = vector.load %arg5[%c0_4, %c0_5, %c0_6] : memref<4x1x32xf32, #tpu.memory_space<vmem>>, vector<1x1x32xf32>
    %5 = vector.shape_cast %4 : vector<1x1x32xf32> to vector<1x32xf32>
    %c1 = arith.constant 1 : index
    %c0_7 = arith.constant 0 : index
    %c0_8 = arith.constant 0 : index
    %6 = vector.load %arg5[%c1, %c0_7, %c0_8] : memref<4x1x32xf32, #tpu.memory_space<vmem>>, vector<1x1x32xf32>
    %7 = vector.shape_cast %6 : vector<1x1x32xf32> to vector<1x32xf32>
    %c2 = arith.constant 2 : index
    %c0_9 = arith.constant 0 : index
    %c0_10 = arith.constant 0 : index
    %8 = vector.load %arg5[%c2, %c0_9, %c0_10] : memref<4x1x32xf32, #tpu.memory_space<vmem>>, vector<1x1x32xf32>
    %9 = vector.shape_cast %8 : vector<1x1x32xf32> to vector<1x32xf32>
    %c3 = arith.constant 3 : index
    %c0_11 = arith.constant 0 : index
    %c0_12 = arith.constant 0 : index
    %10 = vector.load %arg5[%c3, %c0_11, %c0_12] : memref<4x1x32xf32, #tpu.memory_space<vmem>>, vector<1x1x32xf32>
    %11 = vector.shape_cast %10 : vector<1x1x32xf32> to vector<1x32xf32>
    %c0_13 = arith.constant 0 : index
    %c0_14 = arith.constant 0 : index
    %12 = vector.load %arg1[%c0_13, %c0_14] : memref<8x32xf32, #tpu.memory_space<vmem>>, vector<8x32xf32>
    %c0_15 = arith.constant 0 : index
    %c0_16 = arith.constant 0 : index
    %13 = vector.load %arg2[%c0_15, %c0_16] : memref<8x32xf32, #tpu.memory_space<vmem>>, vector<8x32xf32>
    %c0_17 = arith.constant 0 : index
    %c0_18 = arith.constant 0 : index
    %14 = vector.load %arg3[%c0_17, %c0_18] : memref<8x32xf32, #tpu.memory_space<vmem>>, vector<8x32xf32>
    %cst = arith.constant dense<0.000000e+00> : vector<8x32xf32>
    %15 = tpu.matmul %12, %0, %cst {dimension_numbers = #tpu.dot_dimension_numbers<[1], [0], [0], [1], [0, 0, 1, 1], [], []>} : vector<8x32xf32>, vector<32x32xf32>, vector<8x32xf32> -> vector<8x32xf32>
    %16 = vector.broadcast %5 : vector<1x32xf32> to vector<8x32xf32>
    %17 = arith.addf %15, %16 : vector<8x32xf32>
    %cst_19 = arith.constant dense<0.000000e+00> : vector<8x32xf32>
    %18 = tpu.matmul %13, %1, %cst_19 {dimension_numbers = #tpu.dot_dimension_numbers<[1], [0], [0], [1], [0, 0, 1, 1], [], []>} : vector<8x32xf32>, vector<32x32xf32>, vector<8x32xf32> -> vector<8x32xf32>
    %19 = vector.broadcast %7 : vector<1x32xf32> to vector<8x32xf32>
    %20 = arith.addf %18, %19 : vector<8x32xf32>
    %cst_20 = arith.constant dense<0.000000e+00> : vector<8x32xf32>
    %21 = tpu.matmul %14, %2, %cst_20 {dimension_numbers = #tpu.dot_dimension_numbers<[1], [0], [0], [1], [0, 0, 1, 1], [], []>} : vector<8x32xf32>, vector<32x32xf32>, vector<8x32xf32> -> vector<8x32xf32>
    %22 = vector.broadcast %9 : vector<1x32xf32> to vector<8x32xf32>
    %23 = arith.addf %21, %22 : vector<8x32xf32>
    %24 = vector.extract_strided_slice %17 {offsets = [0, 0], sizes = [8, 8], strides = [1, 1]} : vector<8x32xf32> to vector<8x8xf32>
    %25 = vector.extract_strided_slice %20 {offsets = [0, 0], sizes = [8, 8], strides = [1, 1]} : vector<8x32xf32> to vector<8x8xf32>
    %26 = vector.extract_strided_slice %23 {offsets = [0, 0], sizes = [8, 8], strides = [1, 1]} : vector<8x32xf32> to vector<8x8xf32>
    %cst_21 = arith.constant dense<0.000000e+00> : vector<8x8xf32>
    %27 = tpu.matmul %24, %25, %cst_21 {dimension_numbers = #tpu.dot_dimension_numbers<[1], [1], [0], [0], [0, 0, 1, 0], [], []>} : vector<8x8xf32>, vector<8x8xf32>, vector<8x8xf32> -> vector<8x8xf32>
    %cst_22 = arith.constant dense<0xFF800000> : vector<8xf32>
    %28 = vector.multi_reduction <maximumf>, %27, %cst_22 [1] : vector<8x8xf32> to vector<8xf32>
    %29 = vector.shape_cast %28 : vector<8xf32> to vector<8x1xf32>
    %30 = vector.broadcast %29 : vector<8x1xf32> to vector<8x8xf32>
    %31 = arith.subf %27, %30 : vector<8x8xf32>
    %32 = math.exp %31 : vector<8x8xf32>
    %cst_23 = arith.constant dense<0.000000e+00> : vector<8xf32>
    %33 = vector.multi_reduction <add>, %32, %cst_23 [1] : vector<8x8xf32> to vector<8xf32>
    %34 = vector.shape_cast %33 : vector<8xf32> to vector<8x1xf32>
    %35 = vector.broadcast %34 : vector<8x1xf32> to vector<8x8xf32>
    %36 = arith.divf %32, %35 : vector<8x8xf32>
    %cst_24 = arith.constant dense<0.000000e+00> : vector<8x8xf32>
    %37 = tpu.matmul %36, %26, %cst_24 {dimension_numbers = #tpu.dot_dimension_numbers<[1], [0], [0], [1], [0, 0, 1, 1], [], []>} : vector<8x8xf32>, vector<8x8xf32>, vector<8x8xf32> -> vector<8x8xf32>
    %38 = vector.extract_strided_slice %17 {offsets = [0, 8], sizes = [8, 8], strides = [1, 1]} : vector<8x32xf32> to vector<8x8xf32>
    %39 = vector.extract_strided_slice %20 {offsets = [0, 8], sizes = [8, 8], strides = [1, 1]} : vector<8x32xf32> to vector<8x8xf32>
    %40 = vector.extract_strided_slice %23 {offsets = [0, 8], sizes = [8, 8], strides = [1, 1]} : vector<8x32xf32> to vector<8x8xf32>
    %cst_25 = arith.constant dense<0.000000e+00> : vector<8x8xf32>
    %41 = tpu.matmul %38, %39, %cst_25 {dimension_numbers = #tpu.dot_dimension_numbers<[1], [1], [0], [0], [0, 0, 1, 0], [], []>} : vector<8x8xf32>, vector<8x8xf32>, vector<8x8xf32> -> vector<8x8xf32>
    %cst_26 = arith.constant dense<0xFF800000> : vector<8xf32>
    %42 = vector.multi_reduction <maximumf>, %41, %cst_26 [1] : vector<8x8xf32> to vector<8xf32>
    %43 = vector.shape_cast %42 : vector<8xf32> to vector<8x1xf32>
    %44 = vector.broadcast %43 : vector<8x1xf32> to vector<8x8xf32>
    %45 = arith.subf %41, %44 : vector<8x8xf32>
    %46 = math.exp %45 : vector<8x8xf32>
    %cst_27 = arith.constant dense<0.000000e+00> : vector<8xf32>
    %47 = vector.multi_reduction <add>, %46, %cst_27 [1] : vector<8x8xf32> to vector<8xf32>
    %48 = vector.shape_cast %47 : vector<8xf32> to vector<8x1xf32>
    %49 = vector.broadcast %48 : vector<8x1xf32> to vector<8x8xf32>
    %50 = arith.divf %46, %49 : vector<8x8xf32>
    %cst_28 = arith.constant dense<0.000000e+00> : vector<8x8xf32>
    %51 = tpu.matmul %50, %40, %cst_28 {dimension_numbers = #tpu.dot_dimension_numbers<[1], [0], [0], [1], [0, 0, 1, 1], [], []>} : vector<8x8xf32>, vector<8x8xf32>, vector<8x8xf32> -> vector<8x8xf32>
    %52 = vector.extract_strided_slice %17 {offsets = [0, 16], sizes = [8, 8], strides = [1, 1]} : vector<8x32xf32> to vector<8x8xf32>
    %53 = vector.extract_strided_slice %20 {offsets = [0, 16], sizes = [8, 8], strides = [1, 1]} : vector<8x32xf32> to vector<8x8xf32>
    %54 = vector.extract_strided_slice %23 {offsets = [0, 16], sizes = [8, 8], strides = [1, 1]} : vector<8x32xf32> to vector<8x8xf32>
    %cst_29 = arith.constant dense<0.000000e+00> : vector<8x8xf32>
    %55 = tpu.matmul %52, %53, %cst_29 {dimension_numbers = #tpu.dot_dimension_numbers<[1], [1], [0], [0], [0, 0, 1, 0], [], []>} : vector<8x8xf32>, vector<8x8xf32>, vector<8x8xf32> -> vector<8x8xf32>
    %cst_30 = arith.constant dense<0xFF800000> : vector<8xf32>
    %56 = vector.multi_reduction <maximumf>, %55, %cst_30 [1] : vector<8x8xf32> to vector<8xf32>
    %57 = vector.shape_cast %56 : vector<8xf32> to vector<8x1xf32>
    %58 = vector.broadcast %57 : vector<8x1xf32> to vector<8x8xf32>
    %59 = arith.subf %55, %58 : vector<8x8xf32>
    %60 = math.exp %59 : vector<8x8xf32>
    %cst_31 = arith.constant dense<0.000000e+00> : vector<8xf32>
    %61 = vector.multi_reduction <add>, %60, %cst_31 [1] : vector<8x8xf32> to vector<8xf32>
    %62 = vector.shape_cast %61 : vector<8xf32> to vector<8x1xf32>
    %63 = vector.broadcast %62 : vector<8x1xf32> to vector<8x8xf32>
    %64 = arith.divf %60, %63 : vector<8x8xf32>
    %cst_32 = arith.constant dense<0.000000e+00> : vector<8x8xf32>
    %65 = tpu.matmul %64, %54, %cst_32 {dimension_numbers = #tpu.dot_dimension_numbers<[1], [0], [0], [1], [0, 0, 1, 1], [], []>} : vector<8x8xf32>, vector<8x8xf32>, vector<8x8xf32> -> vector<8x8xf32>
    %66 = vector.extract_strided_slice %17 {offsets = [0, 24], sizes = [8, 8], strides = [1, 1]} : vector<8x32xf32> to vector<8x8xf32>
    %67 = vector.extract_strided_slice %20 {offsets = [0, 24], sizes = [8, 8], strides = [1, 1]} : vector<8x32xf32> to vector<8x8xf32>
    %68 = vector.extract_strided_slice %23 {offsets = [0, 24], sizes = [8, 8], strides = [1, 1]} : vector<8x32xf32> to vector<8x8xf32>
    %cst_33 = arith.constant dense<0.000000e+00> : vector<8x8xf32>
    %69 = tpu.matmul %66, %67, %cst_33 {dimension_numbers = #tpu.dot_dimension_numbers<[1], [1], [0], [0], [0, 0, 1, 0], [], []>} : vector<8x8xf32>, vector<8x8xf32>, vector<8x8xf32> -> vector<8x8xf32>
    %cst_34 = arith.constant dense<0xFF800000> : vector<8xf32>
    %70 = vector.multi_reduction <maximumf>, %69, %cst_34 [1] : vector<8x8xf32> to vector<8xf32>
    %71 = vector.shape_cast %70 : vector<8xf32> to vector<8x1xf32>
    %72 = vector.broadcast %71 : vector<8x1xf32> to vector<8x8xf32>
    %73 = arith.subf %69, %72 : vector<8x8xf32>
    %74 = math.exp %73 : vector<8x8xf32>
    %cst_35 = arith.constant dense<0.000000e+00> : vector<8xf32>
    %75 = vector.multi_reduction <add>, %74, %cst_35 [1] : vector<8x8xf32> to vector<8xf32>
    %76 = vector.shape_cast %75 : vector<8xf32> to vector<8x1xf32>
    %77 = vector.broadcast %76 : vector<8x1xf32> to vector<8x8xf32>
    %78 = arith.divf %74, %77 : vector<8x8xf32>
    %cst_36 = arith.constant dense<0.000000e+00> : vector<8x8xf32>
    %79 = tpu.matmul %78, %68, %cst_36 {dimension_numbers = #tpu.dot_dimension_numbers<[1], [0], [0], [1], [0, 0, 1, 1], [], []>} : vector<8x8xf32>, vector<8x8xf32>, vector<8x8xf32> -> vector<8x8xf32>
    %80 = tpu.concatenate %37, %51, %65, %79 in 1 : vector<8x8xf32>, vector<8x8xf32>, vector<8x8xf32>, vector<8x8xf32> -> vector<8x32xf32>
    %cst_37 = arith.constant dense<0.000000e+00> : vector<8x32xf32>
    %81 = tpu.matmul %80, %3, %cst_37 {dimension_numbers = #tpu.dot_dimension_numbers<[1], [0], [0], [1], [0, 0, 1, 1], [], []>} : vector<8x32xf32>, vector<32x32xf32>, vector<8x32xf32> -> vector<8x32xf32>
    %82 = vector.broadcast %11 : vector<1x32xf32> to vector<8x32xf32>
    %83 = arith.addf %81, %82 : vector<8x32xf32>
    %c0_38 = arith.constant 0 : index
    %c0_39 = arith.constant 0 : index
    %84 = vector.load %arg6[%c0_38, %c0_39] : memref<8x32xf32, #tpu.memory_space<vmem>>, vector<8x32xf32>
    tpu.vector_store %arg6[%c0_38, %c0_39], %83 {strides = array<i32>} : memref<8x32xf32, #tpu.memory_space<vmem>>, vector<8x32xf32>,
    return
  }
  func.func @transform_0(%arg0: i32) -> (i32, i32) {
    %c0_i32 = arith.constant 0 : i32
    %c0_i32_0 = arith.constant 0 : i32
    return %arg0, %c0_i32 : i32, i32
  }
  func.func @transform_1(%arg0: i32) -> (i32, i32) {
    %c0_i32 = arith.constant 0 : i32
    %c0_i32_0 = arith.constant 0 : i32
    return %arg0, %c0_i32 : i32, i32
  }
  func.func @transform_2(%arg0: i32) -> (i32, i32) {
    %c0_i32 = arith.constant 0 : i32
    %c0_i32_0 = arith.constant 0 : i32
    return %arg0, %c0_i32 : i32, i32
  }
  func.func @transform_3(%arg0: i32) -> (i32, i32) {
    %c0_i32 = arith.constant 0 : i32
    %c0_i32_0 = arith.constant 0 : i32
    %c0_i32_1 = arith.constant 0 : i32
    return %c0_i32, %c0_i32_0 : i32, i32
  }
  func.func @transform_4(%arg0: i32) -> (i32, i32, i32) {
    %c0_i32 = arith.constant 0 : i32
    %c0_i32_0 = arith.constant 0 : i32
    %c0_i32_1 = arith.constant 0 : i32
    %c0_i32_2 = arith.constant 0 : i32
    return %c0_i32, %c0_i32_0, %c0_i32_1 : i32, i32, i32
  }
  func.func @transform_5(%arg0: i32) -> (i32, i32) {
    %c0_i32 = arith.constant 0 : i32
    %c0_i32_0 = arith.constant 0 : i32
    return %arg0, %c0_i32 : i32, i32
  }
}

</mosaic_0001>

<bundles_post_ra>
// kernel: tpu_custom_call.1
= control target key start
LH: loop header
LB: loop body
LE: loop exit
PB: predicated region body
PF: predicated region fallthrough
CT: control target
= control target key end

     0   :  { %10 = vsyncpa [#allocation3], 0  ;;  %s1944_s0 = inlined_call_operand.vmem [shape: f32[16,32], index: 0, kind: input, shape index: {}]   ;;  %s1945_s1 = inlined_call_operand.vmem [shape: f32[16,32], index: 1, kind: input, shape index: {}]   ;;  %s1946_s2 = inlined_call_operand.vmem [shape: f32[16,32], index: 2, kind: input, shape index: {}]   ;;  %s1947_s3 = inlined_call_operand.vmem [shape: f32[128,32], index: 3, kind: input, shape index: {}]   ;;  %s1948_s4 = inlined_call_operand.vmem [shape: f32[4,1,32], index: 4, kind: input, shape index: {}]   ;;  %s1949_s5 = inlined_call_operand.hbm [shape: f32[16,32], index: 5, kind: output, shape index: {}]  }
   0x1   :  { %12 = vsyncpa [#allocation3 + $0x1], 0  ;;  %s1688_s18 = smov 0   ;;  %s1690_s19 = smov 0  }
   0x2   :  { %s1692_s20 = smov 0   ;;  %s1694_s21 = smov 0  }
   0x3 LB: > { %s1709_s22 = sadd.s32 4294967295, %s1647_s21   ;;  %s1369_s23 = sadd.s32 4294967294, %s1647_s21   ;;  %s1647_s21 = sphi %s1694_s21, %s1955_s21   ;;  %s1643_s20 = sphi %s1692_s20, %s1954_s20   ;;  %s1639_s19 = sphi %s1690_s19, %s1953_s19   ;;  %s1635_s18 = sphi %s1688_s18, %s1952_s18  }
   0x4   : > { %s1713_s24 = sadd.s32 1, %s1647_s21   ;;  %s145_s25 = sadd.s32 1, %s1643_s20 }
   0x5   : > { %s142_s26 = ssub.s32 %s1647_s21, %s1713_s24  ;;  %p155_p0 = scmp.ne.s32.totalorder %s1643_s20, %s1639_s19 }
   0x6   : > { %p143_p1 = scmp.eq.s32.totalorder %s142_s26, 0  ;;  %p156_p2 = scmp.eq.s32.totalorder %s1709_s22, 1 }
   0x7   : > { %p161_p3 = scmp.ne.s32.totalorder %s1639_s19, %s1635_s18  ;;  %p162_p4 = scmp.eq.s32.totalorder %s1369_s23, 1 }
   0x8   : > { %s1724_s27 = scalar_select %p143_p1, %s1643_s20, %s145_s25  }
   0x9   : > { %p1726_p5 = por %p156_p2, %p155_p0  ;;  %p1730_p6 = por %p162_p4, %p161_p3 }
   0xa   : > { %p1372_p7 = scmp.ge.s32.totalorder %s1647_s21, 1  ;;  %p207_p8 = scmp.lt.s32.totalorder %s1647_s21, 3 }
   0xc   : > { %p208_p9 = pnand %p1372_p7, %p207_p8 }
   0xd   : > { %p242_p10 = scmp.lt.s32.totalorder (!%p208_p9), %s1709_s22, 1  ;;  %s1651_s17 = smov (!%p208_p9), 120  }
   0xe   : > { %211 = sbr.rel (%p208_p9) target bundleno = 1822 (0x71e), region = 40  ;;  %s1652_s25 = smov (!%p208_p9), 112  }
   0xf   : > { %s1653_s26 = smov (!%p208_p9), 104   ;;  %s1655_s11 = smov (!%p208_p9), 16  }
  0x10   : > { %s1656_s12 = smov (!%p208_p9), 24   ;;  %s1401_s16 = sshll.u32 (!%p208_p9), %s1709_s22, 7 }
  0x11   : > { %s1908_s6 = scalar_lea.hbm (!%p208_p9), %s1949_s5, %s1401_s16 }
  0x13   : > { %v261_v0 = vld [vmem:[%s1947_s3 + $0x38] sm:$0xff]  ;;  %v1649_v2 = vmov 0.0   ;;  %v260_v3 = vld [vmem:[%s1947_s3 + $0x30] sm:$0xff]  ;;  %s243_s13 = scalar_select %p242_p10, %s1709_s22, 1  ;;  %v259_v5 = vld [vmem:[%s1947_s3 + $0x28] sm:$0xff]  ;;  %vm286_vm0 = vcmask 261120  }
  0x14   : > { %v257_v1 = vld [vmem:[%s1947_s3 + $0x18] sm:$0xff]  ;;  %1451 = vmatprep.subr.mxu1 %v1649_v2  ;;  %1440 = vmatprep.subr.mxu0 %v1649_v2  ;;  %v256_v4 = vld [vmem:[%s1947_s3 + $0x10] sm:$0xff]  ;;  %v255_v6 = vld [vmem:[%s1947_s3 + $0x8] sm:$0xff]  ;;  %vm1650_vm1 = vmmov 0   ;;  %vm518_vm2 = vcmask 64512   ;;  %vm1188_vm3 = vcmask 130048  }
  0x15   : > { %1452 = vmatpush3.msra.mxu1 %v261_v0  ;;  %1441 = vmatpush3.msra.mxu0 %v257_v1  ;;  %s1760_s23 = sshll.u32 %s243_s13, 3  ;;  %v258_v7 = vld [vmem:[%s1947_s3 + $0x20] sm:$0xff]  ;;  %v265_v19 = vld [vmem:[%s1947_s3 + $0x58] sm:$0xff]  ;;  %v264_v20 = vld [vmem:[%s1947_s3 + $0x50] sm:$0xff]  ;;  %vm1190_vm4 = vcmask 195584   ;;  %s1657_s22 = smov [#allocation2]  }
  0x16   : > { %1453 = vmatprep.subr.mxu1 %v1649_v2  ;;  %1442 = vmatprep.subr.mxu0 %v1649_v2  ;;  %s249_s7 = scalar_lea.vmem %s1945_s1, %s1760_s23  ;;  %s245_s10 = scalar_lea.vmem %s1944_s0, %s1760_s23  ;;  %v254_v9 = vld [vmem:[%s1947_s3] sm:$0xff]  ;;  %v263_v21 = vld [vmem:[%s1947_s3 + $0x48] sm:$0xff] }
  0x17   : > { %1454 = vmatpush3.msra.mxu1 %v260_v3  ;;  %1443 = vmatpush3.msra.mxu0 %v256_v4  ;;  %v278_v8 = vld [vmem:[%s249_s7] sm:$0xff]  ;;  %s253_s13 = scalar_lea.vmem %s1946_s2, %s1760_s23  ;;  %s1591_s9 = sshll.u32 %s1657_s22, 4  ;;  %s1592_s9 = int_to_ptr.vmem [resolvable:$false] %s1591_s9 }
  0x18   : > { %1455 = vmatprep.subr.mxu1 %v1649_v2  ;;  %1444 = vmatprep.subr.mxu0 %v1649_v2  ;;  %v277_v10 = vld [vmem:[%s245_s10] sm:$0xff]  ;;  %s1654_s10 = smov 8  }
  0x19   : > { %1456 = vmatpush3.msra.mxu1 %v259_v5  ;;  %1445 = vmatpush3.msra.mxu0 %v255_v6  ;;  %v1382_v11 = vld [vmem:[%s1948_s4 + $0x1] ss:$0 sm:$0xff]  ;;  %v1380_v13 = vld [vmem:[%s1948_s4] ss:$0 sm:$0xff]  ;;  %v1384_v32 = vld [vmem:[%s1948_s4 + $0x2] ss:$0 sm:$0xff] }
  0x1a   : > { %1457 = vmatprep.subr.mxu1 %v1649_v2  ;;  %1459 = vmatprep.mubr.msk.f32.mxu1 %vm1650_vm1, %v1649_v2  ;;  %v262_v22 = vld [vmem:[%s1947_s3 + $0x40] sm:$0xff] }
  0x1b   : > { %1458 = vmatpush3.msra.mxu1 %v258_v7  ;;  %1446 = vmatprep.subr.mxu0 %v1649_v2  ;;  %v279_v23 = vld [vmem:[%s253_s13] sm:$0xff]  ;;  %s239_s13 = sand.u32 1, %s1639_s19  }
  0x1c   : > { %1460 = vmatmul.mubr.msk.f32.vlgmr.msra.gmra.mxu1 %vm286_vm0, %v278_v8  ;;  %1447 = vmatpush3.msra.mxu0 %v254_v9  ;;  %s1373_s14 = sshll.u32 %s239_s13, 3  ;;  %s1273_s7 = scalar_lea.sflag [#allocation3], %s239_s13 }
  0x1d   : > { %1448 = vmatprep.mubr.msk.f32.mxu0 %vm1650_vm1, %v1649_v2  ;;  %1473 = vmatprep.subr.mxu1 %v1649_v2 }
  0x1e   : > { %1449 = vmatmul.mubr.msk.f32.vlgmr.msra.gmra.mxu0 %vm286_vm0, %v277_v10  ;;  %1475 = vmatprep.mubr.msk.f32.mxu1 %vm1650_vm1, %v1649_v2 }
  0x1f   : > { %1462 = vmatprep.subr.mxu0 %v1649_v2  ;;  %1470 = vmatprep.mubr.msk.f32.mxu0 %vm1650_vm1, %v1649_v2 }
  0x20   : > { %1463 = vmatpush3.msra.mxu0 %v265_v19 }
  0x21   : > { %1464 = vmatprep.subr.mxu0 %v1649_v2 }
  0x22   : > { %1465 = vmatpush3.msra.mxu0 %v264_v20  ;;  %v269_v20 = vld [vmem:[%s1947_s3 + $0x78] sm:$0xff] }
  0x23   : > { %1466 = vmatprep.subr.mxu0 %v1649_v2 }
  0x24   : > { %1467 = vmatpush3.msra.mxu0 %v263_v21  ;;  %v268_v21 = vld [vmem:[%s1947_s3 + $0x70] sm:$0xff] }
  0x25   : > { %1468 = vmatprep.subr.mxu0 %v1649_v2 }
  0x26   : > { %1469 = vmatpush3.msra.mxu0 %v262_v22  ;;  %v267_v22 = vld [vmem:[%s1947_s3 + $0x68] sm:$0xff] }
  0x27   : > { %1471 = vmatmul.mubr.msk.f32.vlgmr.msra.gmra.mxu0 %vm286_vm0, %v279_v23  ;;  %1493 = vmatprep.subr.mxu0 %v1649_v2  ;;  %v266_v23 = vld [vmem:[%s1947_s3 + $0x60] sm:$0xff] }
  0x28   : > { %1495 = vmatprep.mubr.msk.f32.mxu0 %vm1650_vm1, %v1649_v2 }
  0xdc   : > { %v435_v12 = vpop.f32.mrf.mxu1 }
  0xdd   : > { %v436_v14 = vadd.f32 %v1382_v11, %v435_v12 }
  0xde   : > { %v356_v15 = vpop.f32.mrf.mxu0  ;;  %v1461_v16 = vpop.f32.mrf.mxu1 }
  0xdf   : > { %v357_v17 = vadd.f32 %v1380_v13, %v356_v15  ;;  %681 = vrot.lane.b32.xlu1 %v436_v14, %s1651_s17  ;;  %1474 = vmatpush3.xpose.msk.msra.mxu1 %vm518_vm2, %v436_v14 }
  0xe0   : > { %v1450_v18 = vpop.f32.mrf.mxu0  ;;  %1478 = vmatprep.subr.mxu1 %v1649_v2 }
  0xe2   : > { %1476 = vmatmul.mubr.msk.f32.vlgmr.msra.gmra.mxu1 %vm518_vm2, %v357_v17 }
  0xe3   : > { %679 = vrot.lane.b32.xlu1 %v357_v17, %s1651_s17  ;;  %1480 = vmatprep.mubr.msk.f32.mxu1 %vm1650_vm1, %v1649_v2 }
  0xe7   : > { %845 = vrot.lane.b32.xlu1 %v357_v17, %s1652_s25  ;;  %v514_v33 = vpop.f32.mrf.mxu0 }
  0xe8   : > { %v1836_v34 = vadd.f32 %v1384_v32, %v514_v33 }
  0xe9   : > { %v1472_v35 = vpop.f32.mrf.mxu0 }
  0xea   : > { %1479 = vmatpush3.msra.mxu1 %v1836_v34  ;;  %v1398_v35 = vld [vmem:[%s1948_s4 + $0x3] ss:$0 sm:$0xff] }
  0xeb   : > { %1012 = vrot.lane.b32.xlu1 %v436_v14, %s1653_s26  ;;  %1483 = vmatprep.subr.mxu1 %v1649_v2 }
  0xef   : > { %1010 = vrot.lane.b32.xlu1 %v357_v17, %s1653_s26 }
 0x151   : > { %v682_v36 = vpop.permute.xlu1 %681 }
 0x155   : > { %v680_v37 = vpop.permute.xlu1 %679 }
 0x159   : > { %v846_v38 = vpop.permute.xlu1 %845 }
 0x15d   : > { %v1013_v41 = vpop.permute.xlu1 %1012 }
 0x161   : > { %v1011_v42 = vpop.permute.xlu1 %1010 }
 0x1a2   : > { %v591_v24 = vpop.f32.mrf.mxu1 }
 0x1a3   : > { %v595_v25 = vsel %vm518_vm2, %v591_v24, -inf }
 0x1a4   : > { %596 = vmax.xlane.f32.xlu0 %v595_v25  ;;  %v1477_v26 = vpop.f32.mrf.mxu1 }
 0x22d   : > { %v597_v27 = vpop.xlane.xlu0 %596 }
 0x22e   : > { %v598_v28 = vsub.f32 %v591_v24, %v597_v27 }
 0x230   : > { %v599_v29 = vmul.f32 1.442695, %v598_v28 }
 0x232   : > { %1571 = vpow2.f32 %v599_v29 }
 0x23f   : > { %v1572_v30 = vpop.eup %1571 }
 0x240   : > { %v601_v31 = vsel %vm518_vm2, %v1572_v30, 0.0 }
 0x241   : > { %602 = vadd.xlane.f32.xlu0 %v601_v31 }
 0x257   : > { %847 = vrot.lane.b32.xlu0 %v436_v14, %s1652_s25 }
 0x2ca   : > { %v603_v39 = vpop.xlane.xlu0 %602 }
 0x2cb   : > { %1573 = vrcp.f32 %v603_v39 }
 0x2ce   : > { %v848_v40 = vpop.permute.xlu0 %847 }
 0x2cf   : > { %1494 = vmatpush3.xpose.msk.msra.mxu0 %vm518_vm2, %v848_v40 }
 0x2d0   : > { %1503 = vmatprep.subr.mxu0 %v1649_v2 }
 0x2d2   : > { %1496 = vmatmul.mubr.msk.f32.vlgmr.msra.gmra.mxu0 %vm518_vm2, %v846_v38 }
 0x2d3   : > { %1504 = vmatpush3.xpose.msk.msra.mxu0 %vm518_vm2, %v1013_v41  ;;  %1505 = vmatprep.mubr.msk.f32.mxu0 %vm1650_vm1, %v1649_v2 }
 0x2d4   : > { %1513 = vmatprep.subr.mxu0 %v1649_v2 }
 0x2d6   : > { %1506 = vmatmul.mubr.msk.f32.vlgmr.msra.gmra.mxu0 %vm518_vm2, %v1011_v42 }
 0x2d7   : > { %1521 = vmatprep.mubr.msk.f32.mxu0 %vm1650_vm1, %v1649_v2  ;;  %1514 = vmatpush3.msra.mxu0 %v269_v20 }
 0x2d8   : > { %v1574_v43 = vpop.eup %1573  ;;  %1515 = vmatprep.subr.mxu0 %v1649_v2 }
 0x2d9   : > { %v605_v44 = vmul.f32 %v1574_v43, %v1572_v30  ;;  %1516 = vmatpush3.msra.mxu0 %v268_v21 }
 0x2da   : > { %1517 = vmatprep.subr.mxu0 %v1649_v2 }
 0x2db   : > { %1481 = vmatmul.mubr.msk.f32.vlgmr.msra.gmra.mxu1 %vm518_vm2, %v605_v44  ;;  %1518 = vmatpush3.msra.mxu0 %v267_v22 }
 0x2dc   : > { %1484 = vmatpush3.xpose.msk.msra.mxu1 %vm518_vm2, %v682_v36  ;;  %1485 = vmatprep.mubr.msk.f32.mxu1 %vm1650_vm1, %v1649_v2 }
 0x2dd   : > { %1488 = vmatprep.subr.mxu1 %v1649_v2  ;;  %1519 = vmatprep.subr.mxu0 %v1649_v2 }
 0x2de   : > { %1520 = vmatpush3.msra.mxu0 %v266_v23 }
 0x2df   : > { %1486 = vmatmul.mubr.msk.f32.vlgmr.msra.gmra.mxu1 %vm518_vm2, %v680_v37 }
 0x2e0   : > { %1490 = vmatprep.mubr.msk.f32.mxu1 %vm1650_vm1, %v1649_v2 }
 0x392   : > { %v919_v45 = vpop.f32.mrf.mxu0 }
 0x393   : > { %v923_v46 = vsel %vm518_vm2, %v919_v45, -inf }
 0x394   : > { %924 = vmax.xlane.f32.xlu0 %v923_v46  ;;  %v1497_v47 = vpop.f32.mrf.mxu0 }
 0x396   : > { %v1084_v48 = vpop.f32.mrf.mxu0 }
 0x397   : > { %v1088_v55 = vsel %vm518_vm2, %v1084_v48, -inf }
 0x398   : > { %v1507_v49 = vpop.f32.mrf.mxu0 }
 0x39b   : > { %v1860_v50 = vpop.f32.mrf.mxu1 }
 0x39d   : > { %v1482_v51 = vpop.f32.mrf.mxu1 }
 0x39f   : > { %v753_v52 = vpop.f32.mrf.mxu1 }
 0x3a0   : > { %v757_v53 = vsel %vm518_vm2, %v753_v52, -inf }
 0x3a1   : > { %758 = vmax.xlane.f32.xlu1 %v757_v53  ;;  %v1487_v54 = vpop.f32.mrf.mxu1 }
 0x3a5   : > { %1089 = vmax.xlane.f32.xlu1 %v1088_v55 }
 0x41d   : > { %v925_v56 = vpop.xlane.xlu0 %924 }
 0x41e   : > { %v926_v57 = vsub.f32 %v919_v45, %v925_v56 }
 0x420   : > { %v927_v58 = vmul.f32 1.442695, %v926_v57 }
 0x422   : > { %1575 = vpow2.f32 %v927_v58 }
 0x42a   : > { %v759_v59 = vpop.xlane.xlu1 %758 }
 0x42b   : > { %v760_v4 = vsub.f32 %v753_v52, %v759_v59 }
 0x42d   : > { %v761_v5 = vmul.f32 1.442695, %v760_v4 }
 0x42e   : > { %v1090_v60 = vpop.xlane.xlu1 %1089 }
 0x42f   : > { %v1576_v61 = vpop.eup %1575  ;;  %v1091_v62 = vsub.f32 %v1084_v48, %v1090_v60 }
 0x430   : > { %v929_v63 = vsel %vm518_vm2, %v1576_v61, 0.0 }
 0x431   : > { %v1092_v0 = vmul.f32 1.442695, %v1091_v62  ;;  %930 = vadd.xlane.f32.xlu0 %v929_v63 }
 0x433   : > { %1577 = vpow2.f32 %v1092_v0 }
 0x434   : > { %1579 = vpow2.f32 %v761_v5 }
 0x440   : > { %v1578_v1 = vpop.eup %1577 }
 0x441   : > { %v1094_v3 = vsel %vm518_vm2, %v1578_v1, 0.0  ;;  %v1580_v6 = vpop.eup %1579 }
 0x442   : > { %1095 = vadd.xlane.f32.xlu1 %v1094_v3  ;;  %v763_v7 = vsel %vm518_vm2, %v1580_v6, 0.0 }
 0x447   : > { %769 = vrot.lane.b32.xlu0 %v1836_v34, %s1651_s17  ;;  %s241_s17 = scalar_lea.vmem [#allocation2], %s1373_s14 }
 0x453   : > { %934 = vrot.lane.b32.xlu1 %v1836_v34, %s1652_s25  ;;  %s1286_s25 = sshll.u32 %s241_s17, 4  ;;  %s1287_s25 = int_to_ptr.vmem [resolvable:$true] %s1286_s25 }
 0x454   : > { %s1587_s8 = scalar_lea.vmem %s1287_s25, 128  ;;  %p1594_p0 = scmp.lt.s32.totalorder %s1287_s25, %s1592_s9 }
 0x455   : > { %p1588_p11 = scmp.ne.s32.totalorder %s1287_s25, %s1587_s8 }
 0x457   : > { %p1589_p12 = pnand %p1588_p11, %p1726_p5 }
 0x459   : > { %p1590_p13 = pneg %p1589_p12 }
 0x477   : > { %764 = vadd.xlane.f32.xlu1 %v763_v7 }
 0x488   : > { %1099 = vrot.lane.b32.xlu1 %v1836_v34, %s1653_s26 }
 0x4ba   : > { %v931_v8 = vpop.xlane.xlu0 %930 }
 0x4be   : > { %v770_v9 = vpop.permute.xlu0 %769 }
 0x4bf   : > { %1489 = vmatpush3.msra.mxu1 %v770_v9 }
 0x4c0   : > { %1498 = vmatprep.subr.mxu1 %v1649_v2 }
 0x4cb   : > { %v1096_v10 = vpop.xlane.xlu1 %1095 }
 0x4cf   : > { %v935_v11 = vpop.permute.xlu1 %934 }
 0x500   : > { %v765_v12 = vpop.xlane.xlu1 %764 }
 0x501   : > { %1581 = vrcp.f32 %v765_v12 }
 0x502   : > { %1583 = vrcp.f32 %v931_v8 }
 0x503   : > { %1585 = vrcp.f32 %v1096_v10 }
 0x504   : > { %v1100_v18 = vpop.permute.xlu1 %1099 }
 0x50e   : > { %v1582_v13 = vpop.eup %1581 }
 0x50f   : > { %v767_v14 = vmul.f32 %v1582_v13, %v1580_v6  ;;  %v1584_v15 = vpop.eup %1583 }
 0x510   : > { %v933_v16 = vmul.f32 %v1584_v15, %v1576_v61  ;;  %v1586_v17 = vpop.eup %1585 }
 0x511   : > { %1491 = vmatmul.mubr.msk.f32.vlgmr.msra.gmra.mxu1 %vm518_vm2, %v767_v14  ;;  %v1098_v19 = vmul.f32 %v1586_v17, %v1578_v1 }
 0x512   : > { %1499 = vmatpush3.msra.mxu1 %v935_v11  ;;  %1500 = vmatprep.mubr.msk.f32.mxu1 %vm1650_vm1, %v1649_v2 }
 0x513   : > { %1508 = vmatprep.subr.mxu1 %v1649_v2 }
 0x515   : > { %1501 = vmatmul.mubr.msk.f32.vlgmr.msra.gmra.mxu1 %vm518_vm2, %v933_v16 }
 0x516   : > { %1509 = vmatpush3.msra.mxu1 %v1100_v18  ;;  %1510 = vmatprep.mubr.msk.f32.mxu1 %vm1650_vm1, %v1649_v2 }
 0x519   : > { %1511 = vmatmul.mubr.msk.f32.vlgmr.msra.gmra.mxu1 %vm518_vm2, %v1098_v19 }
 0x5d1   : > { %v841_v24 = vpop.f32.mrf.mxu1 }
 0x5d2   : > { %1176 = vrot.lane.b32.xlu0 %v841_v24, %s1654_s10  ;;  %s1593_s10 = scalar_lea.vmem %s1592_s9, 256 }
 0x5d3   : > { %v1492_v25 = vpop.f32.mrf.mxu1  ;;  %p1595_p1 = scmp.lt.s32.totalorder %s1593_s10, %s1587_s8 }
 0x5d5   : > { %v1006_v26 = vpop.f32.mrf.mxu1  ;;  %p1596_p2 = por %p1595_p1, %p1594_p0 }
 0x5d6   : > { %1180 = vrot.lane.b32.xlu1 %v1006_v26, %s1655_s11 }
 0x5d7   : > { %v1502_v27 = vpop.f32.mrf.mxu1  ;;  %p1597_p3 = pnand %p1596_p2, %p1590_p13 }
 0x5d9   : > { %v1171_v28 = vpop.f32.mrf.mxu1 }
 0x5da   : > { %1184 = vrot.lane.b32.xlu0 %v1171_v28, %s1656_s12 }
 0x5db   : > { %v1512_v29 = vpop.f32.mrf.mxu1 }
 0x644   : > { %v1177_v2 = vpop.permute.xlu0 %1176 }
 0x645   : > { %v1187_v31 = vsel %vm518_vm2, %v1860_v50, %v1177_v2 }
 0x648   : > { %v1181_v30 = vpop.permute.xlu1 %1180 }
 0x649   : > { %v1189_v32 = vsel %vm1188_vm3, %v1187_v31, %v1181_v30 }
 0x64c   : > { %v1185_v33 = vpop.permute.xlu0 %1184 }
 0x64d   : > { %v1191_v34 = vsel %vm1190_vm4, %v1189_v32, %v1185_v33 }
 0x64e   : > { %1522 = vmatmul.mubr.msk.f32.vlgmr.msra.gmra.mxu0 %vm286_vm0, %v1191_v34 }
 0x70e   : > { %v1267_v36 = vpop.f32.mrf.mxu0 }
 0x70f   : > { %v1268_v37 = vadd.f32 %v1398_v35, %v1267_v36 }
 0x710   : > { %v1523_v38 = vpop.f32.mrf.mxu0 }
 0x711   : > { %1271 = vst.msk [vmem:[%s241_s17] sm:$0xff] %vm286_vm0, %v1268_v37 }
 0x712   : > { %1600 = shalt.err (!%p1597_p3)
}
 0x713   : > { %s1601_s11 = scalar_lea.hbm %s1908_s6, 128  ;;  %s1605_s14 = scalar_lea.hbm %s1949_s5, 256 }
 0x714   : > { %p1602_p4 = scmp.ne.s32.totalorder %s1908_s6, %s1601_s11  ;;  %p1606_p9 = scmp.lt.s32.totalorder %s1908_s6, %s1949_s5 }
 0x715   : > { %p1607_p10 = scmp.lt.s32.totalorder %s1605_s14, %s1601_s11 }
 0x716   : > { %p1603_p7 = pnand %p1602_p4, %p1726_p5 }
 0x717   : > { %p1608_p11 = por %p1607_p10, %p1606_p9 }
 0x718   : > { %p1604_p8 = pneg %p1603_p7 }
 0x71a   : > { %p1609_p12 = pnand %p1608_p11, %p1604_p8 }
 0x71c   : > { %1612 = shalt.err (!%p1609_p12)
}
 0x71d   : > { %1524 = dma.vmem_to_hbm [thread:$0]  (%p1726_p5), %s1287_s25, 128, %s1908_s6, %s1273_s7  }
 0x71e PF: > { %p1530_p13 = scmp.ge.s32.totalorder %s1647_s21, 2  ;;  %s1298_s16 = sand.u32 1, %s1635_s18  }
 0x71f   : > { %s1299_s17 = scalar_lea.sflag [#allocation3], %s1298_s16 }
 0x720   : > { %p1527_p0 = pnand %p1530_p13, %p1730_p6 }
 0x722   : > { %p1528_p1 = pneg %p1527_p0 }
 0x724   : > { %1630 = dma.done.wait (%p1528_p1), %s1299_s17, 128  }
 0x725   : > { %1632 = vsyncadd (%p1528_p1), %s1299_s17, 4294967168  ;;  %p15_p2 = scmp.ge.s32.totalorder %s1713_s24, 4   ;;  %s1952_s18 = smov %s1639_s19 }
 0x726   : > { %s1953_s19 = smov %s1643_s20  ;;  %s1954_s20 = smov %s1724_s27 }
 0x727   : > { %s1955_s21 = smov %s1713_s24  ;;  %17 = sbr.rel (!%p15_p2) target bundleno = 3 (0x3), region = 84 }
 0x72c   :  { %1304 = vsyncpa [#allocation3], 1 }
 0x72d   :  { %1306 = vsyncpa [#allocation3 + $0x1], 1 }

</bundles_post_ra>
